<compile_context>
chip_gen: v7x
topology: tpu7x:2x2x1
jax: 0.10.0
libtpu: 0.0.40
codegen_flags: <defaults>
</compile_context>

<pallas_src>
import functools

import numpy as np

import jax
import jax.numpy as jnp
from jax.experimental import pallas as pl
from jax.experimental.pallas import tpu as pltpu


def _round_up(x, m):
    return (x + m - 1) // m * m


def _build_tap_masks(H, W):
    """(9, H*W) f32 {0,1} validity masks, tap order (dh, dw) row-major.

    A tap is valid at flat index l iff reading flat index l + (dh*W + dw) stays
    inside the image AND the column w + dw stays inside the row (same-padding
    semantics of a 3x3 conv on the flattened H*W axis).
    """
    L = H * W
    lane = np.arange(L)
    col = lane % W
    masks = np.zeros((9, L), np.float32)
    t = 0
    for dh in (-1, 0, 1):
        for dw in (-1, 0, 1):
            s = dh * W + dw
            ok = (lane + s >= 0) & (lane + s < L) & (col + dw >= 0) & (col + dw < W)
            masks[t] = ok.astype(np.float32)
            t += 1
    return masks


def _conv_block_kernel(masks_ref, x_ref, *refs, stack_num, images_per_step, shifts):
    """Fused stack of conv3x3(same)+bias+ReLU over a block of images.

    masks_ref: (9, L) f32 tap-validity masks (precomputed in the wrapper).
    x_ref:     (images_per_step, Cin_pad, L)
    refs:      w_0 (Cout_pad, 9*Cin_pad) bf16, b_0 (Cout_pad, 1) f32, ..., o_ref
    o_ref:     (images_per_step, Cout_pad, L)
    """
    o_ref = refs[-1]
    param_refs = refs[:-1]
    L = x_ref.shape[-1]

    # Load weights/biases once per grid step (shared across images in the block).
    w_list = [param_refs[2 * i][...] for i in range(stack_num)]
    b_list = [param_refs[2 * i + 1][...] for i in range(stack_num)]

    # Hoist mask rows once; reused by both layers and every image.
    masks = masks_ref[...]
    mask_rows = [masks[t:t + 1, :] for t in range(9)]          # (1, L) each

    for img in range(images_per_step):
        h = x_ref[img].astype(jnp.float32)                     # (Cin_pad, L)
        for i in range(stack_num):
            taps = []
            for t, s in enumerate(shifts):
                if s == 0:
                    taps.append(h)                             # center tap: no mask
                else:
                    # shifted[l] = h[l + s] (zero outside) == roll(-s) * mask
                    rolled = pltpu.roll(h, shift=(-s) % L, axis=1)
                    taps.append(rolled * mask_rows[t])
            # Channel dims are padded to multiples of 8 -> sublane-aligned concat.
            slab = jnp.concatenate(taps, axis=0)               # (9*C, L) f32
            acc = jnp.dot(w_list[i], slab.astype(w_list[i].dtype),
                          preferred_element_type=jnp.float32)  # (Cout_pad, L) f32
            h = jnp.maximum(acc + b_list[i], 0.0)              # bias + ReLU (f32 VPU)
        o_ref[img] = h.astype(o_ref.dtype)


def _pick_batch_tiling(N):
    """Choose (images_per_step, grid_len).

    Bigger blocks amortize the ~0.35us fixed per-grid-step cost; but keep >= 2
    'parallel' grid steps when possible so both v7x TensorCores get work.
    """
    per_step = N // 2 if (N >= 2 and N % 2 == 0) else 1
    per_step = max(1, min(per_step, 8))        # bound per-step VMEM footprint
    while N % per_step:
        per_step -= 1
    return per_step, N // per_step


def conv_block_forward(x_nchw, params, *, dot_dtype=jnp.bfloat16):
    """ConvBlock forward (stack of conv3x3 'same' + bias + ReLU). NCHW in / out."""
    N, Cin, H, W = x_nchw.shape
    L = H * W
    assert L % 128 == 0, "kernel assumes H*W is a multiple of 128 (lane-dense stores)"
    stack_num = len(params)
    Cout = params[0][0].shape[0]
    cin_pad = _round_up(Cin, 8)    # 8-row tiles -> sublane-aligned im2col slab
    cout_pad = _round_up(Cout, 8)

    images_per_step, grid_n = _pick_batch_tiling(N)

    # Free reshape (NCHW is already (N, C, H*W)-contiguous) + tiny channel pad.
    # Padded channels are zero and pair with zero weight rows, so results match.
    x_flat = x_nchw.reshape(N, Cin, L)
    if cin_pad != Cin:
        x_flat = jnp.pad(x_flat, ((0, 0), (0, cin_pad - Cin), (0, 0)))

    masks = jnp.asarray(_build_tap_masks(H, W))                    # (9, L) f32
    shifts = tuple(dh * W + dw for dh in (-1, 0, 1) for dw in (-1, 0, 1))

    # Pack weights once: OIHW -> (Cout_pad, 9*Cin_pad), rows ordered (kh, kw, ci),
    # zero-padded channels, bf16 operands for the MXU (f32 accumulate in-kernel).
    flat_params = []
    in_specs = [
        pl.BlockSpec((9, L), lambda n: (0, 0)),                           # masks
        pl.BlockSpec((images_per_step, cin_pad, L), lambda n: (n, 0, 0)),  # x
    ]
    for i, (w_oihw, b) in enumerate(params):
        co, ci, kh, kw = w_oihw.shape
        assert kh == 3 and kw == 3, "fused kernel assumes kernel_size=3"
        ci_pad = cin_pad if i == 0 else cout_pad
        w_pad = jnp.zeros((cout_pad, ci_pad, 3, 3), jnp.float32)
        w_pad = w_pad.at[:co, :ci].set(w_oihw.astype(jnp.float32))
        w2d = jnp.transpose(w_pad, (0, 2, 3, 1)).reshape(cout_pad, 9 * ci_pad)
        w2d = w2d.astype(dot_dtype)
        b2d = jnp.zeros((cout_pad, 1), jnp.float32).at[:co, 0].set(
            b.astype(jnp.float32))
        flat_params += [w2d, b2d]
        in_specs += [
            pl.BlockSpec((cout_pad, 9 * ci_pad), lambda n: (0, 0)),
            pl.BlockSpec((cout_pad, 1), lambda n: (0, 0)),
        ]

    kernel = functools.partial(
        _conv_block_kernel, stack_num=stack_num,
        images_per_step=images_per_step, shifts=shifts)

    y_flat = pl.pallas_call(
        kernel,
        out_shape=jax.ShapeDtypeStruct((N, cout_pad, L), x_nchw.dtype),
        grid_spec=pltpu.PrefetchScalarGridSpec(
            num_scalar_prefetch=0,
            grid=(grid_n,),
            in_specs=in_specs,
            out_specs=pl.BlockSpec((images_per_step, cout_pad, L),
                                   lambda n: (n, 0, 0)),
        ),
        compiler_params=pltpu.CompilerParams(
            dimension_semantics=("parallel",),
            vmem_limit_bytes=32 * 1024 * 1024),   # safe on v5e/v6e/v7x; >> usage here
    )(masks, x_flat, *flat_params)

    y = y_flat.reshape(N, cout_pad, H, W)
    if cout_pad != Cout:
        y = y[:, :Cout]
    return y


def init_conv_block_params(key, in_channels, out_channels, kernel_size=3,
                           stack_num=2):
    """Deterministic synthetic params, PyTorch Conv2d weight layout (O, I, kh, kw)."""
    params = []
    for i in range(stack_num):
        cin = in_channels if i == 0 else out_channels
        key, kw_, kb_ = jax.random.split(key, 3)
        fan_in = cin * kernel_size * kernel_size
        bound = 1.0 / (fan_in ** 0.5)
        w = jax.random.uniform(kw_, (out_channels, cin, kernel_size, kernel_size),
                               minval=-bound, maxval=bound, dtype=jnp.float32)
        b = jax.random.uniform(kb_, (out_channels,),
                               minval=-bound, maxval=bound, dtype=jnp.float32)
        params.append((w, b))
    return params


if __name__ == "__main__":
    key = jax.random.PRNGKey(0)
    k_x, k_p = jax.random.split(key)

    N, Cin, H, W = 2, 4, 16, 16
    Cout = 8
    x = jax.random.normal(k_x, (N, Cin, H, W), dtype=jnp.float32)
    params = init_conv_block_params(k_p, Cin, Cout, kernel_size=3, stack_num=2)

    forward = jax.jit(conv_block_forward)
    y = forward(x, params)
    y = jax.block_until_ready(y)
    assert y.shape == (N, Cout, H, W), y.shape

    # Reference: lax conv with the same bf16-operand / f32-accumulate quantization
    # as the kernel's MXU matmuls (remaining diff is accumulation order only).
    r = x
    for w_oihw, b in params:
        r = jax.lax.conv_general_dilated(
            r.astype(jnp.bfloat16), w_oihw.astype(jnp.bfloat16),
            window_strides=(1, 1), padding="SAME",
            dimension_numbers=("NCHW", "OIHW", "NCHW"),
            preferred_element_type=jnp.float32)
        r = jnp.maximum(r + b[None, :, None, None], 0.0)
    err = float(jnp.max(jnp.abs(y - r)))
    assert jnp.allclose(y, r, atol=5e-3, rtol=5e-3), err

    print("KERNEL_OK")
</pallas_src>

<mosaic_0001>
module attributes {stable_mosaic.version = 11 : i64} {
  func.func @_conv_block_kernel(%arg0: i32, %arg1: memref<9x256xf32, #tpu.memory_space<vmem>>, %arg2: memref<1x8x256xf32, #tpu.memory_space<vmem>>, %arg3: memref<8x72xbf16, #tpu.memory_space<vmem>>, %arg4: memref<8x1xf32, #tpu.memory_space<vmem>>, %arg5: memref<8x72xbf16, #tpu.memory_space<vmem>>, %arg6: memref<8x1xf32, #tpu.memory_space<vmem>>, %arg7: memref<1x8x256xf32, #tpu.memory_space<vmem>>) attributes {dimension_semantics = [#tpu.dimension_semantics<parallel>], iteration_bounds = array<i64: 2>, scalar_prefetch = 0 : i64, scratch_operands = 0 : i64, tpu.core_type = #tpu.core_type<tc>, window_params = [{pipeline_mode = #tpu.pipeline_mode<synchronous>, transform_indices = @transform_0, window_bounds = array<i64: 9, 256>}, {transform_indices = @transform_1, window_bounds = array<i64: 1, 8, 256>}, {pipeline_mode = #tpu.pipeline_mode<synchronous>, transform_indices = @transform_2, window_bounds = array<i64: 8, 72>}, {pipeline_mode = #tpu.pipeline_mode<synchronous>, transform_indices = @transform_3, window_bounds = array<i64: 8, 1>}, {pipeline_mode = #tpu.pipeline_mode<synchronous>, transform_indices = @transform_4, window_bounds = array<i64: 8, 72>}, {pipeline_mode = #tpu.pipeline_mode<synchronous>, transform_indices = @transform_5, window_bounds = array<i64: 8, 1>}, {transform_indices = @transform_6, window_bounds = array<i64: 1, 8, 256>}]} {
    %c0 = arith.constant 0 : index
    %c0_0 = arith.constant 0 : index
    %0 = vector.load %arg3[%c0, %c0_0] : memref<8x72xbf16, #tpu.memory_space<vmem>>, vector<8x72xbf16>
    %c0_1 = arith.constant 0 : index
    %c0_2 = arith.constant 0 : index
    %1 = vector.load %arg5[%c0_1, %c0_2] : memref<8x72xbf16, #tpu.memory_space<vmem>>, vector<8x72xbf16>
    %c0_3 = arith.constant 0 : index
    %c0_4 = arith.constant 0 : index
    %2 = vector.load %arg4[%c0_3, %c0_4] : memref<8x1xf32, #tpu.memory_space<vmem>>, vector<8x1xf32>
    %c0_5 = arith.constant 0 : index
    %c0_6 = arith.constant 0 : index
    %3 = vector.load %arg6[%c0_5, %c0_6] : memref<8x1xf32, #tpu.memory_space<vmem>>, vector<8x1xf32>
    %c0_7 = arith.constant 0 : index
    %c0_8 = arith.constant 0 : index
    %4 = vector.load %arg1[%c0_7, %c0_8] : memref<9x256xf32, #tpu.memory_space<vmem>>, vector<9x256xf32>
    %5 = vector.extract_strided_slice %4 {offsets = [0, 0], sizes = [1, 256], strides = [1, 1]} : vector<9x256xf32> to vector<1x256xf32>
    %6 = vector.extract_strided_slice %4 {offsets = [1, 0], sizes = [1, 256], strides = [1, 1]} : vector<9x256xf32> to vector<1x256xf32>
    %7 = vector.extract_strided_slice %4 {offsets = [2, 0], sizes = [1, 256], strides = [1, 1]} : vector<9x256xf32> to vector<1x256xf32>
    %8 = vector.extract_strided_slice %4 {offsets = [3, 0], sizes = [1, 256], strides = [1, 1]} : vector<9x256xf32> to vector<1x256xf32>
    %9 = vector.extract_strided_slice %4 {offsets = [5, 0], sizes = [1, 256], strides = [1, 1]} : vector<9x256xf32> to vector<1x256xf32>
    %10 = vector.extract_strided_slice %4 {offsets = [6, 0], sizes = [1, 256], strides = [1, 1]} : vector<9x256xf32> to vector<1x256xf32>
    %11 = vector.extract_strided_slice %4 {offsets = [7, 0], sizes = [1, 256], strides = [1, 1]} : vector<9x256xf32> to vector<1x256xf32>
    %12 = vector.extract_strided_slice %4 {offsets = [8, 0], sizes = [1, 256], strides = [1, 1]} : vector<9x256xf32> to vector<1x256xf32>
    %c0_9 = arith.constant 0 : index
    %c0_10 = arith.constant 0 : index
    %c0_11 = arith.constant 0 : index
    %13 = vector.load %arg2[%c0_9, %c0_10, %c0_11] : memref<1x8x256xf32, #tpu.memory_space<vmem>>, vector<1x8x256xf32>
    %14 = vector.shape_cast %13 : vector<1x8x256xf32> to vector<8x256xf32>
    %c17_i32 = arith.constant 17 : i32
    %15 = tpu.dynamic_rotate %14 by %c17_i32 dim 1 : vector<8x256xf32>, i32 -> vector<8x256xf32>
    %16 = vector.broadcast %5 : vector<1x256xf32> to vector<8x256xf32>
    %17 = arith.mulf %15, %16 : vector<8x256xf32>
    %c16_i32 = arith.constant 16 : i32
    %18 = tpu.dynamic_rotate %14 by %c16_i32 dim 1 : vector<8x256xf32>, i32 -> vector<8x256xf32>
    %19 = vector.broadcast %6 : vector<1x256xf32> to vector<8x256xf32>
    %20 = arith.mulf %18, %19 : vector<8x256xf32>
    %c15_i32 = arith.constant 15 : i32
    %21 = tpu.dynamic_rotate %14 by %c15_i32 dim 1 : vector<8x256xf32>, i32 -> vector<8x256xf32>
    %22 = vector.broadcast %7 : vector<1x256xf32> to vector<8x256xf32>
    %23 = arith.mulf %21, %22 : vector<8x256xf32>
    %c1_i32 = arith.constant 1 : i32
    %24 = tpu.dynamic_rotate %14 by %c1_i32 dim 1 : vector<8x256xf32>, i32 -> vector<8x256xf32>
    %25 = vector.broadcast %8 : vector<1x256xf32> to vector<8x256xf32>
    %26 = arith.mulf %24, %25 : vector<8x256xf32>
    %c255_i32 = arith.constant 255 : i32
    %27 = tpu.dynamic_rotate %14 by %c255_i32 dim 1 : vector<8x256xf32>, i32 -> vector<8x256xf32>
    %28 = vector.broadcast %9 : vector<1x256xf32> to vector<8x256xf32>
    %29 = arith.mulf %27, %28 : vector<8x256xf32>
    %c241_i32 = arith.constant 241 : i32
    %30 = tpu.dynamic_rotate %14 by %c241_i32 dim 1 : vector<8x256xf32>, i32 -> vector<8x256xf32>
    %31 = vector.broadcast %10 : vector<1x256xf32> to vector<8x256xf32>
    %32 = arith.mulf %30, %31 : vector<8x256xf32>
    %c240_i32 = arith.constant 240 : i32
    %33 = tpu.dynamic_rotate %14 by %c240_i32 dim 1 : vector<8x256xf32>, i32 -> vector<8x256xf32>
    %34 = vector.broadcast %11 : vector<1x256xf32> to vector<8x256xf32>
    %35 = arith.mulf %33, %34 : vector<8x256xf32>
    %c239_i32 = arith.constant 239 : i32
    %36 = tpu.dynamic_rotate %14 by %c239_i32 dim 1 : vector<8x256xf32>, i32 -> vector<8x256xf32>
    %37 = vector.broadcast %12 : vector<1x256xf32> to vector<8x256xf32>
    %38 = arith.mulf %36, %37 : vector<8x256xf32>
    %39 = tpu.concatenate %17, %20, %23, %26, %14, %29, %32, %35, %38 in 0 : vector<8x256xf32>, vector<8x256xf32>, vector<8x256xf32>, vector<8x256xf32>, vector<8x256xf32>, vector<8x256xf32>, vector<8x256xf32>, vector<8x256xf32>, vector<8x256xf32> -> vector<72x256xf32>
    %40 = arith.truncf %39 : vector<72x256xf32> to vector<72x256xbf16>
    %cst = arith.constant dense<0.000000e+00> : vector<8x256xf32>
    %41 = tpu.matmul %0, %40, %cst {dimension_numbers = #tpu.dot_dimension_numbers<[1], [0], [0], [1], [0, 0, 1, 1], [], []>} : vector<8x72xbf16>, vector<72x256xbf16>, vector<8x256xf32> -> vector<8x256xf32>
    %42 = vector.broadcast %2 : vector<8x1xf32> to vector<8x256xf32>
    %43 = arith.addf %41, %42 : vector<8x256xf32>
    %cst_12 = arith.constant 0.000000e+00 : f32
    %44 = vector.broadcast %cst_12 : f32 to vector<8x256xf32>
    %45 = arith.maximumf %43, %44 : vector<8x256xf32>
    %c17_i32_13 = arith.constant 17 : i32
    %46 = tpu.dynamic_rotate %45 by %c17_i32_13 dim 1 : vector<8x256xf32>, i32 -> vector<8x256xf32>
    %47 = vector.broadcast %5 : vector<1x256xf32> to vector<8x256xf32>
    %48 = arith.mulf %46, %47 : vector<8x256xf32>
    %c16_i32_14 = arith.constant 16 : i32
    %49 = tpu.dynamic_rotate %45 by %c16_i32_14 dim 1 : vector<8x256xf32>, i32 -> vector<8x256xf32>
    %50 = vector.broadcast %6 : vector<1x256xf32> to vector<8x256xf32>
    %51 = arith.mulf %49, %50 : vector<8x256xf32>
    %c15_i32_15 = arith.constant 15 : i32
    %52 = tpu.dynamic_rotate %45 by %c15_i32_15 dim 1 : vector<8x256xf32>, i32 -> vector<8x256xf32>
    %53 = vector.broadcast %7 : vector<1x256xf32> to vector<8x256xf32>
    %54 = arith.mulf %52, %53 : vector<8x256xf32>
    %c1_i32_16 = arith.constant 1 : i32
    %55 = tpu.dynamic_rotate %45 by %c1_i32_16 dim 1 : vector<8x256xf32>, i32 -> vector<8x256xf32>
    %56 = vector.broadcast %8 : vector<1x256xf32> to vector<8x256xf32>
    %57 = arith.mulf %55, %56 : vector<8x256xf32>
    %c255_i32_17 = arith.constant 255 : i32
    %58 = tpu.dynamic_rotate %45 by %c255_i32_17 dim 1 : vector<8x256xf32>, i32 -> vector<8x256xf32>
    %59 = vector.broadcast %9 : vector<1x256xf32> to vector<8x256xf32>
    %60 = arith.mulf %58, %59 : vector<8x256xf32>
    %c241_i32_18 = arith.constant 241 : i32
    %61 = tpu.dynamic_rotate %45 by %c241_i32_18 dim 1 : vector<8x256xf32>, i32 -> vector<8x256xf32>
    %62 = vector.broadcast %10 : vector<1x256xf32> to vector<8x256xf32>
    %63 = arith.mulf %61, %62 : vector<8x256xf32>
    %c240_i32_19 = arith.constant 240 : i32
    %64 = tpu.dynamic_rotate %45 by %c240_i32_19 dim 1 : vector<8x256xf32>, i32 -> vector<8x256xf32>
    %65 = vector.broadcast %11 : vector<1x256xf32> to vector<8x256xf32>
    %66 = arith.mulf %64, %65 : vector<8x256xf32>
    %c239_i32_20 = arith.constant 239 : i32
    %67 = tpu.dynamic_rotate %45 by %c239_i32_20 dim 1 : vector<8x256xf32>, i32 -> vector<8x256xf32>
    %68 = vector.broadcast %12 : vector<1x256xf32> to vector<8x256xf32>
    %69 = arith.mulf %67, %68 : vector<8x256xf32>
    %70 = tpu.concatenate %48, %51, %54, %57, %45, %60, %63, %66, %69 in 0 : vector<8x256xf32>, vector<8x256xf32>, vector<8x256xf32>, vector<8x256xf32>, vector<8x256xf32>, vector<8x256xf32>, vector<8x256xf32>, vector<8x256xf32>, vector<8x256xf32> -> vector<72x256xf32>
    %71 = arith.truncf %70 : vector<72x256xf32> to vector<72x256xbf16>
    %cst_21 = arith.constant dense<0.000000e+00> : vector<8x256xf32>
    %72 = tpu.matmul %1, %71, %cst_21 {dimension_numbers = #tpu.dot_dimension_numbers<[1], [0], [0], [1], [0, 0, 1, 1], [], []>} : vector<8x72xbf16>, vector<72x256xbf16>, vector<8x256xf32> -> vector<8x256xf32>
    %73 = vector.broadcast %3 : vector<8x1xf32> to vector<8x256xf32>
    %74 = arith.addf %72, %73 : vector<8x256xf32>
    %cst_22 = arith.constant 0.000000e+00 : f32
    %75 = vector.broadcast %cst_22 : f32 to vector<8x256xf32>
    %76 = arith.maximumf %74, %75 : vector<8x256xf32>
    %c0_23 = arith.constant 0 : index
    %c0_24 = arith.constant 0 : index
    %c0_25 = arith.constant 0 : index
    %77 = vector.load %arg7[%c0_23, %c0_24, %c0_25] : memref<1x8x256xf32, #tpu.memory_space<vmem>>, vector<1x8x256xf32>
    %78 = vector.shape_cast %77 : vector<1x8x256xf32> to vector<8x256xf32>
    %79 = vector.shape_cast %76 : vector<8x256xf32> to vector<1x8x256xf32>
    tpu.vector_store %arg7[%c0_23, %c0_24, %c0_25], %79 {strides = array<i32>} : memref<1x8x256xf32, #tpu.memory_space<vmem>>, vector<1x8x256xf32>,
    return
  }
  func.func @transform_0(%arg0: i32) -> (i32, i32) {
    %c0_i32 = arith.constant 0 : i32
    %c0_i32_0 = arith.constant 0 : i32
    %c0_i32_1 = arith.constant 0 : i32
    return %c0_i32, %c0_i32_0 : i32, i32
  }
  func.func @transform_1(%arg0: i32) -> (i32, i32, i32) {
    %c0_i32 = arith.constant 0 : i32
    %c0_i32_0 = arith.constant 0 : i32
    %c0_i32_1 = arith.constant 0 : i32
    return %arg0, %c0_i32, %c0_i32_0 : i32, i32, i32
  }
  func.func @transform_2(%arg0: i32) -> (i32, i32) {
    %c0_i32 = arith.constant 0 : i32
    %c0_i32_0 = arith.constant 0 : i32
    %c0_i32_1 = arith.constant 0 : i32
    return %c0_i32, %c0_i32_0 : i32, i32
  }
  func.func @transform_3(%arg0: i32) -> (i32, i32) {
    %c0_i32 = arith.constant 0 : i32
    %c0_i32_0 = arith.constant 0 : i32
    %c0_i32_1 = arith.constant 0 : i32
    return %c0_i32, %c0_i32_0 : i32, i32
  }
  func.func @transform_4(%arg0: i32) -> (i32, i32) {
    %c0_i32 = arith.constant 0 : i32
    %c0_i32_0 = arith.constant 0 : i32
    %c0_i32_1 = arith.constant 0 : i32
    return %c0_i32, %c0_i32_0 : i32, i32
  }
  func.func @transform_5(%arg0: i32) -> (i32, i32) {
    %c0_i32 = arith.constant 0 : i32
    %c0_i32_0 = arith.constant 0 : i32
    %c0_i32_1 = arith.constant 0 : i32
    return %c0_i32, %c0_i32_0 : i32, i32
  }
  func.func @transform_6(%arg0: i32) -> (i32, i32, i32) {
    %c0_i32 = arith.constant 0 : i32
    %c0_i32_0 = arith.constant 0 : i32
    %c0_i32_1 = arith.constant 0 : i32
    return %arg0, %c0_i32, %c0_i32_0 : i32, i32, i32
  }
}

</mosaic_0001>

<bundles_post_ra>
// kernel: conv_block_forward.1
= control target key start
LH: loop header
LB: loop body
LE: loop exit
PB: predicated region body
PF: predicated region fallthrough
CT: control target
= control target key end

     0   :  { %s747_s21 = smov 0   ;;  %s1031_s0 = inlined_call_operand.vmem [shape: f32[9,256], index: 0, kind: input, shape index: {}]   ;;  %s1032_s1 = inlined_call_operand.vmem [shape: f32[2,8,256], index: 1, kind: input, shape index: {}]   ;;  %s1033_s2 = inlined_call_operand.vmem [shape: bf16[8,72], index: 2, kind: input, shape index: {}]   ;;  %s1034_s3 = inlined_call_operand.vmem [shape: f32[8,1], index: 3, kind: input, shape index: {}]   ;;  %s1035_s4 = inlined_call_operand.vmem [shape: bf16[8,72], index: 4, kind: input, shape index: {}]   ;;  %s1036_s5 = inlined_call_operand.vmem [shape: f32[8,1], index: 5, kind: input, shape index: {}]   ;;  %s1037_s6 = inlined_call_operand.vmem [shape: f32[2,8,256], index: 6, kind: output, shape index: {}]  }
   0x1 LB: > { %s658_s22 = sadd.s32 4294967295, %s701_s21   ;;  %p662_p0 = scmp.ge.s32.totalorder %s701_s21, 1  ;;  %s701_s21 = sphi %s747_s21, %s16_s21  }
   0x2   : > { %p212_p1 = scmp.lt.s32.totalorder %s701_s21, 3 }
   0x4   : > { %p213_p2 = pnand %p662_p0, %p212_p1 }
   0x5   : > { %p242_p3 = scmp.lt.s32.totalorder (!%p213_p2), %s658_s22, 1  ;;  %s703_s27 = smov (!%p213_p2), 16   ;;  %v709_v2 = vmov (!%p213_p2), 0   ;;  %v255_v3 = vld [vmem:[%s1034_s3] sm:$0xff] (!%p213_p2)  ;;  %v267_v4 = vlaneseq (!%p213_p2)  ;;  %v816_v10 = vld [vmem:[%s1031_s0 + $0x8] sm:$0xff] (!%p213_p2)  ;;  %vm420_vm8 = vcmask (!%p213_p2), 1043456  }
   0x6   : > { %216 = sbr.rel (%p213_p2) target bundleno = 759 (0x2f7), region = 44  ;;  %s704_s28 = smov (!%p213_p2), 17   ;;  %459 = vmatprep.mubr.bf16.mxu0 (!%p213_p2), %v709_v2  ;;  %694 = vset.pattern.permute.xlu0 (!%p213_p2), %v709_v2  ;;  %v811_v9 = vld [vmem:[%s1031_s0] sm:$0xff] (!%p213_p2)  ;;  %vm416_vm9 = vcmask (!%p213_p2), 588800  }
   0x7   : > { %s705_s29 = smov (!%p213_p2), 15   ;;  %s706_s30 = smov (!%p213_p2), 1   ;;  %590 = vmatprep.mubr.bf16.mxu1 (!%p213_p2), %v709_v2  ;;  %v802_v5 = vshrl.u32 (!%p213_p2), %v267_v4, 7  ;;  %v804_v6 = vand.u32 (!%p213_p2), 127, %v267_v4 }
   0x8   : > { %s707_s7 = smov (!%p213_p2), 127   ;;  %s708_s8 = smov (!%p213_p2), 113  }
   0x9   : > { %s710_s9 = smov (!%p213_p2), 112   ;;  %s711_s10 = smov (!%p213_p2), 111   ;;  %v291_v7 = vsub.s32 (!%p213_p2), 1, %v802_v5  ;;  %v274_v8 = vsub.s32 (!%p213_p2), 0, %v802_v5  ;;  %vm286_vm0 = vcmp.lt.s32.totalorder (!%p213_p2), %v804_v6, 16  ;;  %vm269_vm1 = vcmp.lt.s32.totalorder (!%p213_p2), %v804_v6, 17 }
   0xa   : > { %v308_v19 = vsub.s32 (!%p213_p2), 2, %v802_v5  ;;  %v325_v20 = vsub.s32 (!%p213_p2), 3, %v802_v5  ;;  %vm303_vm2 = vcmp.lt.s32.totalorder (!%p213_p2), %v804_v6, 15  ;;  %vm320_vm3 = vcmp.lt.s32.totalorder (!%p213_p2), %v804_v6, 1 }
   0xb   : > { %v821_v13 = vrot.slane (!%p213_p2), %v811_v9, %v291_v7  ;;  %v824_v14 = vrot.slane (!%p213_p2), %v811_v9, %v274_v8  ;;  %v827_v15 = vrot.slane (!%p213_p2), %v816_v10, %v274_v8  ;;  %v830_v16 = vrot.slane (!%p213_p2), %v816_v10, %v291_v7 }
   0xc   : > { %v342_v33 = vsub.s32 (!%p213_p2), 5, %v802_v5  ;;  %v850_v34 = vrot.slane (!%p213_p2), %v811_v9, %v308_v19  ;;  %v853_v35 = vrot.slane (!%p213_p2), %v816_v10, %v308_v19  ;;  %v856_v36 = vrot.slane (!%p213_p2), %v811_v9, %v325_v20  ;;  %v920_v19 = vld [vmem:[%s1031_s0 + $0x10] ss:$0 sm:$0xff] (!%p213_p2) }
   0xd   : > { %s1039_s22 = smov (!%p242_p3, %s658_s22), 1  ;;  %v859_v37 = vrot.slane %v816_v10, %v325_v20  ;;  %vm337_vm4 = vcmp.lt.s32.totalorder %v804_v6, 127  ;;  %v359_v56 = vsub.s32 6, %v802_v5  ;;  %v376_v59 = vsub.s32 7, %v802_v5  ;;  %v925_v20 = vld [vmem:[%s1031_s0 + $0x18] ss:$0 sm:$0xff] }
   0xe   : > { %s675_s23 = sshll.u32 %s1039_s22, 4  ;;  %v871_v44 = vrot.slane %v811_v9, %v342_v33  ;;  %v874_v45 = vrot.slane %v816_v10, %v342_v33  ;;  %vm354_vm5 = vcmp.lt.s32.totalorder %v804_v6, 113  ;;  %vm371_vm6 = vcmp.lt.s32.totalorder %v804_v6, 112 }
   0xf   : > { %s246_s26 = scalar_lea.vmem %s1032_s1, %s675_s23  ;;  %v892_v2 = vrot.slane %v811_v9, %v359_v56  ;;  %v899_v4 = vrot.slane %v811_v9, %v376_v59  ;;  %v902_v5 = vrot.slane %v816_v10, %v376_v59  ;;  %vm388_vm7 = vcmp.lt.s32.totalorder %v804_v6, 111 }
  0x10   : > { %v763_v0 = vld [vmem:[%s246_s26] sm:$0xff]  ;;  %v769_v1 = vld [vmem:[%s246_s26 + $0x8] sm:$0xff] }
  0x11   : > { %282 = vrot.lane.b32.xlu1 %v763_v0, %s703_s27  ;;  %263 = vrot.lane.b32.xlu0 %v763_v0, %s704_s28 }
  0x15   : > { %284 = vrot.lane.b32.xlu1 %v769_v1, %s703_s27  ;;  %265 = vrot.lane.b32.xlu0 %v769_v1, %s704_s28 }
  0x19   : > { %301 = vrot.lane.b32.xlu1 %v769_v1, %s705_s29  ;;  %299 = vrot.lane.b32.xlu0 %v763_v0, %s705_s29 }
  0x1d   : > { %318 = vrot.lane.b32.xlu1 %v769_v1, %s706_s30  ;;  %316 = vrot.lane.b32.xlu0 %v763_v0, %s706_s30 }
  0x21   : > { %335 = vrot.lane.b32.xlu1 %v769_v1, %s707_s7  ;;  %333 = vrot.lane.b32.xlu0 %v763_v0, %s707_s7 }
  0x25   : > { %352 = vrot.lane.b32.xlu1 %v769_v1, %s708_s8  ;;  %350 = vrot.lane.b32.xlu0 %v763_v0, %s708_s8 }
  0x29   : > { %369 = vrot.lane.b32.xlu1 %v769_v1, %s710_s9  ;;  %367 = vrot.lane.b32.xlu0 %v763_v0, %s710_s9 }
  0x2d   : > { %386 = vrot.lane.b32.xlu1 %v769_v1, %s711_s10  ;;  %384 = vrot.lane.b32.xlu0 %v763_v0, %s711_s10 }
  0x31   : > { %413 = vperm.xlu0 %694, %v255_v3   ;;  %v895_v3 = vrot.slane %v816_v10, %v359_v56 }
  0x83   : > { %v283_v11 = vpop.permute.xlu1 %282  ;;  %v264_v12 = vpop.permute.xlu0 %263 }
  0x87   : > { %v285_v17 = vpop.permute.xlu1 %284  ;;  %v266_v18 = vpop.permute.xlu0 %265 }
  0x88   : > { %v287_v21 = vsel %vm286_vm0, %v283_v11, %v285_v17  ;;  %v288_v22 = vsel %vm286_vm0, %v285_v17, %v283_v11  ;;  %v270_v23 = vsel %vm269_vm1, %v264_v12, %v266_v18  ;;  %v271_v24 = vsel %vm269_vm1, %v266_v18, %v264_v12 }
  0x89   : > { %v297_v25 = vmul.f32 %v821_v13, %v288_v22  ;;  %v280_v26 = vmul.f32 %v824_v14, %v271_v24  ;;  %v281_v27 = vmul.f32 %v827_v15, %v270_v23  ;;  %v298_v28 = vmul.f32 %v830_v16, %v287_v21 }
  0x8b   : > { %v302_v29 = vpop.permute.xlu1 %301  ;;  %v300_v30 = vpop.permute.xlu0 %299  ;;  %v402_v31 = vpack.c.bf16 %v298_v28, %v281_v27  ;;  %v401_v32 = vpack.c.bf16 %v297_v25, %v280_v26 }
  0x8c   : > { %v304_v38 = vsel %vm303_vm2, %v300_v30, %v302_v29  ;;  %v305_v39 = vsel %vm303_vm2, %v302_v29, %v300_v30 }
  0x8d   : > { %427 = vmatprep.subr.bf16.mxu0 %v402_v31  ;;  %v314_v46 = vmul.f32 %v850_v34, %v305_v39  ;;  %v315_v47 = vmul.f32 %v853_v35, %v304_v38 }
  0x8e   : > { %428 = vmatpush1.bf16.msra.mxu0 %v401_v32  ;;  %v253_v32 = vld [vmem:[%s1033_s2] sm:$0xf] }
  0x8f   : > { %v319_v40 = vpop.permute.xlu1 %318  ;;  %v317_v41 = vpop.permute.xlu0 %316 }
  0x90   : > { %v321_v42 = vsel %vm320_vm3, %v317_v41, %v319_v40  ;;  %v322_v43 = vsel %vm320_vm3, %v319_v40, %v317_v41 }
  0x91   : > { %v331_v48 = vmul.f32 %v856_v36, %v322_v43  ;;  %v332_v49 = vmul.f32 %v859_v37, %v321_v42 }
  0x93   : > { %v336_v50 = vpop.permute.xlu1 %335  ;;  %v334_v51 = vpop.permute.xlu0 %333  ;;  %v404_v52 = vpack.c.bf16 %v332_v49, %v315_v47  ;;  %v403_v53 = vpack.c.bf16 %v331_v48, %v314_v46  ;;  %v256_v48 = vld [vmem:[%s1036_s5] sm:$0xff] }
  0x94   : > { %v338_v54 = vsel %vm337_vm4, %v334_v51, %v336_v50  ;;  %v339_v55 = vsel %vm337_vm4, %v336_v50, %v334_v51 }
  0x95   : > { %v348_v57 = vmul.f32 %v871_v44, %v338_v54  ;;  %v349_v58 = vmul.f32 %v874_v45, %v339_v55  ;;  %429 = vmatprep.subr.bf16.mxu0 %v404_v52 }
  0x96   : > { %430 = vmatpush1.bf16.msra.mxu0 %v403_v53 }
  0x97   : > { %v353_v60 = vpop.permute.xlu1 %352  ;;  %v351_v61 = vpop.permute.xlu0 %350  ;;  %v406_v62 = vpack.c.bf16 %v349_v58, %v769_v1  ;;  %v405_v63 = vpack.c.bf16 %v348_v57, %v763_v0 }
  0x98   : > { %v355_v1 = vsel %vm354_vm5, %v351_v61, %v353_v60  ;;  %v356_v0 = vsel %vm354_vm5, %v353_v60, %v351_v61 }
  0x99   : > { %431 = vmatprep.subr.bf16.mxu0 %v406_v62  ;;  %v365_v9 = vmul.f32 %v892_v2, %v355_v1  ;;  %v366_v10 = vmul.f32 %v895_v3, %v356_v0 }
  0x9a   : > { %432 = vmatpush1.bf16.msra.mxu0 %v405_v63 }
  0x9b   : > { %v370_v7 = vpop.permute.xlu1 %369  ;;  %v368_v8 = vpop.permute.xlu0 %367 }
  0x9c   : > { %v372_v11 = vsel %vm371_vm6, %v368_v8, %v370_v7  ;;  %v373_v12 = vsel %vm371_vm6, %v370_v7, %v368_v8 }
  0x9d   : > { %v382_v17 = vmul.f32 %v899_v4, %v372_v11  ;;  %v383_v18 = vmul.f32 %v902_v5, %v373_v12 }
  0x9f   : > { %v387_v21 = vpop.permute.xlu1 %386  ;;  %v385_v22 = vpop.permute.xlu0 %384  ;;  %v408_v23 = vpack.c.bf16 %v383_v18, %v366_v10  ;;  %v407_v24 = vpack.c.bf16 %v382_v17, %v365_v9 }
  0xa0   : > { %v389_v25 = vsel %vm388_vm7, %v385_v22, %v387_v21  ;;  %v390_v26 = vsel %vm388_vm7, %v387_v21, %v385_v22 }
  0xa1   : > { %v399_v27 = vmul.f32 %v920_v19, %v389_v25  ;;  %v400_v28 = vmul.f32 %v925_v20, %v390_v26  ;;  %433 = vmatprep.subr.bf16.mxu0 %v408_v23 }
  0xa2   : > { %434 = vmatpush1.bf16.msra.mxu0 %v407_v24 }
  0xa3   : > { %v409_v29 = vpack.c.bf16 %v399_v27, %v399_v27  ;;  %v410_v30 = vpack.c.bf16 %v400_v28, %v400_v28 }
  0xa5   : > { %669 = vmatprep.subr.msk.bf16.mxu0 %vm420_vm8, %v410_v30  ;;  %v422_v31 = vsel %vm420_vm8, %v409_v29, 0 }
  0xa6   : > { %436 = vmatpush1.bf16.msra.mxu0 %v422_v31 }
  0xa9   : > { %670 = vmatmul.mubr.msk.bf16.vlgmr.msra.gmra.mrb[0].mxu0 %vm416_vm9, %v253_v32 }
  0xb0   : > { %v414_v33 = vpop.permute.xlu0 %413 }
 0x17c   : > { %v461_v38 = vpop.f32.mrb[0].mxu0 }
 0x17d   : > { %v462_v39 = vadd.f32 %v461_v38, %v414_v33  ;;  %v463_v40 = vpop.f32.mrb[1].mxu0 }
 0x17e   : > { %v465_v41 = vpop.f32.mrb[2].mxu0  ;;  %v464_v43 = vadd.f32 %v463_v40, %v414_v33 }
 0x17f   : > { %v939_v42 = vmax.f32 %v462_v39, 0.0  ;;  %v466_v46 = vpop.f32.mrb[3].mxu0 }
 0x180   : > { %v469_v47 = vmax.f32 %v464_v43, 0.0 }
 0x181   : > { %478 = vrot.lane.b32.xlu0 %v939_v42, %s703_s27  ;;  %470 = vrot.lane.b32.xlu1 %v939_v42, %s704_s28 }
 0x185   : > { %486 = vrot.lane.b32.xlu0 %v939_v42, %s705_s29  ;;  %472 = vrot.lane.b32.xlu1 %v469_v47, %s704_s28 }
 0x189   : > { %494 = vrot.lane.b32.xlu0 %v939_v42, %s706_s30  ;;  %480 = vrot.lane.b32.xlu1 %v469_v47, %s703_s27 }
 0x18d   : > { %502 = vrot.lane.b32.xlu0 %v939_v42, %s707_s7  ;;  %488 = vrot.lane.b32.xlu1 %v469_v47, %s705_s29 }
 0x191   : > { %510 = vrot.lane.b32.xlu0 %v939_v42, %s708_s8  ;;  %496 = vrot.lane.b32.xlu1 %v469_v47, %s706_s30 }
 0x195   : > { %518 = vrot.lane.b32.xlu0 %v939_v42, %s710_s9  ;;  %504 = vrot.lane.b32.xlu1 %v469_v47, %s707_s7 }
 0x199   : > { %526 = vrot.lane.b32.xlu0 %v939_v42, %s711_s10  ;;  %512 = vrot.lane.b32.xlu1 %v469_v47, %s708_s8  ;;  %s251_s8 = scalar_lea.vmem %s1037_s6, %s675_s23 }
 0x19d   : > { %546 = vperm.xlu0 %694, %v256_v48   ;;  %520 = vrot.lane.b32.xlu1 %v469_v47, %s710_s9 }
 0x1a1   : > { %528 = vrot.lane.b32.xlu1 %v469_v47, %s711_s10 }
 0x1f3   : > { %v479_v49 = vpop.permute.xlu0 %478  ;;  %v471_v50 = vpop.permute.xlu1 %470 }
 0x1f7   : > { %v487_v51 = vpop.permute.xlu0 %486  ;;  %v473_v52 = vpop.permute.xlu1 %472 }
 0x1f8   : > { %v474_v53 = vsel %vm269_vm1, %v471_v50, %v473_v52  ;;  %v475_v54 = vsel %vm269_vm1, %v473_v52, %v471_v50 }
 0x1f9   : > { %v476_v59 = vmul.f32 %v475_v54, %v824_v14  ;;  %v477_v61 = vmul.f32 %v474_v53, %v827_v15 }
 0x1fb   : > { %v495_v55 = vpop.permute.xlu0 %494  ;;  %v481_v56 = vpop.permute.xlu1 %480 }
 0x1fc   : > { %v482_v57 = vsel %vm286_vm0, %v479_v49, %v481_v56  ;;  %v483_v58 = vsel %vm286_vm0, %v481_v56, %v479_v49 }
 0x1fd   : > { %v484_v60 = vmul.f32 %v483_v58, %v821_v13  ;;  %v485_v62 = vmul.f32 %v482_v57, %v830_v16 }
 0x1ff   : > { %v489_v63 = vpop.permute.xlu1 %488  ;;  %v535_v1 = vpack.c.bf16 %v485_v62, %v477_v61  ;;  %v534_v0 = vpack.c.bf16 %v484_v60, %v476_v59  ;;  %v503_v7 = vpop.permute.xlu0 %502 }
 0x200   : > { %v490_v8 = vsel %vm303_vm2, %v487_v51, %v489_v63  ;;  %v491_v11 = vsel %vm303_vm2, %v489_v63, %v487_v51 }
 0x201   : > { %558 = vmatprep.subr.bf16.mxu1 %v535_v1  ;;  %v492_v15 = vmul.f32 %v491_v11, %v850_v34  ;;  %v493_v16 = vmul.f32 %v490_v8, %v853_v35 }
 0x202   : > { %559 = vmatpush1.bf16.msra.mxu1 %v534_v0 }
 0x203   : > { %v497_v12 = vpop.permute.xlu1 %496  ;;  %v511_v17 = vpop.permute.xlu0 %510 }
 0x204   : > { %v498_v13 = vsel %vm320_vm3, %v495_v55, %v497_v12  ;;  %v499_v14 = vsel %vm320_vm3, %v497_v12, %v495_v55 }
 0x205   : > { %v500_v9 = vmul.f32 %v499_v14, %v856_v36  ;;  %v501_v10 = vmul.f32 %v498_v13, %v859_v37 }
 0x207   : > { %v505_v18 = vpop.permute.xlu1 %504  ;;  %v537_v21 = vpack.c.bf16 %v501_v10, %v493_v16  ;;  %v536_v22 = vpack.c.bf16 %v500_v9, %v492_v15  ;;  %v519_v26 = vpop.permute.xlu0 %518 }
 0x208   : > { %v506_v23 = vsel %vm337_vm4, %v503_v7, %v505_v18  ;;  %v507_v24 = vsel %vm337_vm4, %v505_v18, %v503_v7 }
 0x209   : > { %v508_v25 = vmul.f32 %v506_v23, %v871_v44  ;;  %v509_v34 = vmul.f32 %v507_v24, %v874_v45  ;;  %560 = vmatprep.subr.bf16.mxu1 %v537_v21 }
 0x20a   : > { %561 = vmatpush1.bf16.msra.mxu1 %v536_v22 }
 0x20b   : > { %v513_v35 = vpop.permute.xlu1 %512  ;;  %v539_v36 = vpack.c.bf16 %v509_v34, %v469_v47  ;;  %v538_v37 = vpack.c.bf16 %v508_v25, %v939_v42  ;;  %v527_v38 = vpop.permute.xlu0 %526  ;;  %v254_v47 = vld [vmem:[%s1035_s4] sm:$0xf] }
 0x20c   : > { %v514_v27 = vsel %vm354_vm5, %v511_v17, %v513_v35  ;;  %v515_v28 = vsel %vm354_vm5, %v513_v35, %v511_v17 }
 0x20d   : > { %562 = vmatprep.subr.bf16.mxu1 %v539_v36  ;;  %v516_v30 = vmul.f32 %v514_v27, %v892_v2  ;;  %v517_v31 = vmul.f32 %v515_v28, %v895_v3 }
 0x20e   : > { %563 = vmatpush1.bf16.msra.mxu1 %v538_v37 }
 0x20f   : > { %v521_v29 = vpop.permute.xlu1 %520 }
 0x210   : > { %v522_v44 = vsel %vm371_vm6, %v519_v26, %v521_v29  ;;  %v523_v45 = vsel %vm371_vm6, %v521_v29, %v519_v26 }
 0x211   : > { %v524_v32 = vmul.f32 %v522_v44, %v899_v4  ;;  %v525_v33 = vmul.f32 %v523_v45, %v902_v5 }
 0x213   : > { %v529_v39 = vpop.permute.xlu1 %528  ;;  %v541_v40 = vpack.c.bf16 %v525_v33, %v517_v31  ;;  %v540_v41 = vpack.c.bf16 %v524_v32, %v516_v30 }
 0x214   : > { %v530_v42 = vsel %vm388_vm7, %v527_v38, %v529_v39  ;;  %v531_v43 = vsel %vm388_vm7, %v529_v39, %v527_v38 }
 0x215   : > { %v532_v46 = vmul.f32 %v920_v19, %v530_v42  ;;  %v533_v2 = vmul.f32 %v925_v20, %v531_v43  ;;  %564 = vmatprep.subr.bf16.mxu1 %v541_v40 }
 0x216   : > { %565 = vmatpush1.bf16.msra.mxu1 %v540_v41 }
 0x217   : > { %v542_v3 = vpack.c.bf16 %v532_v46, %v532_v46  ;;  %v543_v4 = vpack.c.bf16 %v533_v2, %v533_v2 }
 0x219   : > { %671 = vmatprep.subr.msk.bf16.mxu1 %vm420_vm8, %v543_v4  ;;  %v553_v5 = vsel %vm420_vm8, %v542_v3, 0 }
 0x21a   : > { %567 = vmatpush1.bf16.msra.mxu1 %v553_v5 }
 0x21c   : > { %v547_v6 = vpop.permute.xlu0 %546 }
 0x21d   : > { %672 = vmatmul.mubr.msk.bf16.vlgmr.msra.gmra.mrb[0].mxu1 %vm416_vm9, %v254_v47 }
 0x2f0   : > { %v592_v48 = vpop.f32.mrb[0].mxu1 }
 0x2f1   : > { %v593_v19 = vadd.f32 %v592_v48, %v547_v6  ;;  %v594_v49 = vpop.f32.mrb[1].mxu1 }
 0x2f2   : > { %v595_v20 = vadd.f32 %v594_v49, %v547_v6  ;;  %v596_v50 = vpop.f32.mrb[2].mxu1 }
 0x2f3   : > { %v599_v51 = vmax.f32 %v593_v19, 0.0  ;;  %v597_v52 = vpop.f32.mrb[3].mxu1 }
 0x2f4   : > { %v600_v53 = vmax.f32 %v595_v20, 0.0 }
 0x2f5   : > { %601 = vst [vmem:[%s251_s8] sm:$0xff] %v599_v51 }
 0x2f6   : > { %602 = vst [vmem:[%s251_s8 + $0x8] sm:$0xff] %v600_v53 }
 0x2f7 PF: > { %s16_s21 = sadd.s32 1, %s701_s21  }
 0x2f8   : > { %p13_p4 = scmp.ge.s32.totalorder %s16_s21, 4  }
 0x2fa   :  { %15 = sbr.rel (!%p13_p4) target bundleno = 1 (0x1), region = 74 }

</bundles_post_ra>
